<compile_context>
chip_gen: v7x
topology: tpu7x:2x2x1
jax: 0.10.0
libtpu: 0.0.40
codegen_flags: <defaults>
</compile_context>

<pallas_src>
import functools

import jax
import jax.numpy as jnp
from jax.experimental import pallas as pl
from jax.experimental.pallas import tpu as pltpu


def _vmem_capacity_bytes(default=64 * 1024 * 1024):
    """Trace-time VMEM capacity query with a conservative (v7x-safe) fallback."""
    try:
        info = pltpu.get_tpu_info()
    except Exception:
        return default
    for name in ("vmem_capacity_bytes", "vmem_size_bytes", "vmem_bytes"):
        v = getattr(info, name, None)
        if isinstance(v, int) and v > 0:
            return v
    return default


def _focal_loss_kernel(x_ref, t_ref, out_ref, *, gamma):
    j = pl.program_id(2)

    logits = x_ref[0].astype(jnp.float32)                 # (C, TILE)

    # numerically-stable log_softmax over the class (sublane) axis
    m = jnp.max(logits, axis=0, keepdims=True)             # (1, TILE)
    z = logits - m
    lse = jnp.log(jnp.sum(jnp.exp(z), axis=0, keepdims=True))
    logp = z - lse                                          # (C, TILE)

    # gather(1, target) via compare+select+reduce (VPU/XLU; no MXU on purpose).
    # Padded lanes carry target = -1 -> one-hot all-false -> logpt == 0 exactly
    # -> pt == 1 -> loss == 0, even if the out-of-range logits are garbage
    # (the where() masks them; reductions stay within each lane).
    tgt = t_ref[0]                                          # (1, TILE) int32
    cls = jax.lax.broadcasted_iota(jnp.int32, logp.shape, 0)
    logpt = jnp.sum(jnp.where(cls == tgt, logp, 0.0), axis=0, keepdims=True)

    pt = jnp.exp(logpt)
    one_minus_pt = jnp.maximum(1.0 - pt, 0.0)               # guard pt > 1 by an ulp

    g = float(gamma)
    if g == 0.0:
        loss = -logpt                                       # (1-pt)**0 == 1
    elif g == int(g) and 0.0 < g <= 8.0:
        focal = one_minus_pt
        for _ in range(int(g) - 1):                         # pure VPU, no EUP power
            focal = focal * one_minus_pt
        loss = -focal * logpt
    else:
        loss = -jnp.power(one_minus_pt, jnp.float32(g)) * logpt

    @pl.when(j == 0)
    def _():
        out_ref[...] = jnp.zeros_like(out_ref)

    out_ref[...] += loss[None, None]                        # vector accumulate


def focal_loss(x, target, gamma=0.0, size_average=False):
    """Focal loss matching the PyTorch FocalLoss.forward.

    x:      (N, C, H, W) float logits (copy-free path) or (rows, C)
    target: (N, H, W) or (rows,) integer class indices
    """
    if x.ndim > 2:
        n, c = x.shape[0], x.shape[1]
        x3 = x.reshape(n, c, -1)                 # (N, C, H*W): free, no copy
    else:
        # 2D path: classes must land on the sublane axis -> one small transpose.
        # TODO(synk): only the >2D path avoids the extra HBM pass entirely.
        c = x.shape[1]
        x3 = jnp.transpose(x)[None]              # (1, C, rows)
        n = 1
    hw = x3.shape[2]
    rows = n * hw

    t2 = target.reshape(n, hw).astype(jnp.int32)

    # Generation-aware tile sizing: double-buffered logits + targets, resident
    # output block, plus ~4 live f32 (C, TILE) temporaries per lane of tile.
    x_bytes = jnp.dtype(x3.dtype).itemsize
    vmem = _vmem_capacity_bytes()                # ~128 MiB v5e/v6e, ~64 MiB v7x
    block_budget = int(vmem * 0.4)
    per_lane = 2 * c * x_bytes + 16 * c + 24
    tile = block_budget // per_lane
    tile = min(tile, 8192, pl.cdiv(hw, 128) * 128)
    tile = max(128, (tile // 128) * 128)

    num_tiles = pl.cdiv(hw, tile)
    # 2-way spatial split -> extra "parallel" grid axis so v7x can use both
    # TensorCores even when n == 1 (no effect on v5e/v6e).
    p_split = 2 if (num_tiles % 2 == 0 and num_tiles >= 2) else 1
    tps = num_tiles // p_split

    # Pad only the (cheap) target array; padded lanes are masked with -1.
    hw_pad = num_tiles * tile
    t3 = jnp.pad(t2, ((0, 0), (0, hw_pad - hw)), constant_values=-1)
    t3 = t3.reshape(n, 1, hw_pad)                # lane-dense int32 targets

    kernel = functools.partial(_focal_loss_kernel, gamma=float(gamma))

    partial = pl.pallas_call(
        kernel,
        out_shape=jax.ShapeDtypeStruct((n, p_split, 1, tile), jnp.float32),
        grid=(n, p_split, tps),
        in_specs=[
            pl.BlockSpec((1, c, tile), lambda b, p, j: (b, 0, p * tps + j)),
            pl.BlockSpec((1, 1, tile), lambda b, p, j: (b, 0, p * tps + j)),
        ],
        out_specs=pl.BlockSpec((1, 1, 1, tile), lambda b, p, j: (b, p, 0, 0)),
        compiler_params=pltpu.CompilerParams(
            dimension_semantics=("parallel", "parallel", "arbitrary"),
            vmem_limit_bytes=int(vmem * 0.7),
        ),
    )(x3, t3)

    total = jnp.sum(partial)                     # tiny (n, p_split, 1, tile) array
    if size_average:
        total = total / jnp.float32(rows)
    return total


def _focal_loss_ref(x, target, gamma=0.0, size_average=False):
    if x.ndim > 2:
        n, c = x.shape[0], x.shape[1]
        x = jnp.transpose(x.reshape(n, c, -1), (0, 2, 1)).reshape(-1, c)
    t = target.reshape(-1)
    logp = jax.nn.log_softmax(x.astype(jnp.float32), axis=-1)
    logpt = jnp.take_along_axis(logp, t[:, None].astype(jnp.int32), axis=1)[:, 0]
    pt = jnp.exp(logpt)
    loss = -((1.0 - pt) ** gamma) * logpt
    return loss.mean() if size_average else loss.sum()


if __name__ == "__main__":
    key = jax.random.PRNGKey(0)
    kx, kt, kx2, kt2 = jax.random.split(key, 4)

    # 4D NCHW input (the module's dim>2 path) — runs copy-free in NCHW layout.
    N, C, H, W = 2, 4, 16, 16
    x = jax.random.normal(kx, (N, C, H, W), dtype=jnp.float32)
    target = jax.random.randint(kt, (N, H, W), 0, C, dtype=jnp.int32)

    for gamma, size_average in [(0.0, False), (2.0, False), (2.0, True), (0.5, False)]:
        out = jax.block_until_ready(focal_loss(x, target, gamma, size_average))
        ref = _focal_loss_ref(x, target, gamma, size_average)
        assert jnp.allclose(out, ref, rtol=1e-4, atol=1e-4), (gamma, size_average, out, ref)

    # 2D (rows, C) path with a non-aligned row count (exercises padding/masking).
    R = 37
    x2 = jax.random.normal(kx2, (R, C), dtype=jnp.float32)
    t2 = jax.random.randint(kt2, (R,), 0, C, dtype=jnp.int32)
    for gamma, size_average in [(2.0, False), (0.0, True)]:
        out = jax.block_until_ready(focal_loss(x2, t2, gamma, size_average))
        ref = _focal_loss_ref(x2, t2, gamma, size_average)
        assert jnp.allclose(out, ref, rtol=1e-4, atol=1e-4), (gamma, size_average, out, ref)

    print("KERNEL_OK")
</pallas_src>

<mosaic_0001>
module attributes {stable_mosaic.version = 11 : i64} {
  func.func @_focal_loss_kernel(%arg0: i32, %arg1: i32, %arg2: i32, %arg3: memref<1x4x256xf32, #tpu.memory_space<vmem>>, %arg4: memref<1x1x256xi32, #tpu.memory_space<vmem>>, %arg5: memref<1x1x1x256xf32, #tpu.memory_space<vmem>>) attributes {dimension_semantics = [#tpu.dimension_semantics<parallel>, #tpu.dimension_semantics<parallel>, #tpu.dimension_semantics<arbitrary>], iteration_bounds = array<i64: 2, 1, 1>, scalar_prefetch = 0 : i64, scratch_operands = 0 : i64, tpu.core_type = #tpu.core_type<tc>, window_params = [{transform_indices = @transform_0, window_bounds = array<i64: 1, 4, 256>}, {transform_indices = @transform_1, window_bounds = array<i64: 1, 1, 256>}, {transform_indices = @transform_2, window_bounds = array<i64: 1, 1, 1, 256>}]} {
    %c0 = arith.constant 0 : index
    %c0_0 = arith.constant 0 : index
    %c0_1 = arith.constant 0 : index
    %0 = vector.load %arg3[%c0, %c0_0, %c0_1] : memref<1x4x256xf32, #tpu.memory_space<vmem>>, vector<1x4x256xf32>
    %1 = vector.shape_cast %0 : vector<1x4x256xf32> to vector<4x256xf32>
    %cst = arith.constant dense<0xFF800000> : vector<256xf32>
    %2 = vector.multi_reduction <maximumf>, %1, %cst [0] : vector<4x256xf32> to vector<256xf32>
    %3 = vector.shape_cast %2 : vector<256xf32> to vector<1x256xf32>
    %4 = vector.broadcast %3 : vector<1x256xf32> to vector<4x256xf32>
    %5 = arith.subf %1, %4 : vector<4x256xf32>
    %6 = math.exp %5 : vector<4x256xf32>
    %cst_2 = arith.constant dense<0.000000e+00> : vector<256xf32>
    %7 = vector.multi_reduction <add>, %6, %cst_2 [0] : vector<4x256xf32> to vector<256xf32>
    %8 = vector.shape_cast %7 : vector<256xf32> to vector<1x256xf32>
    %9 = math.log %8 : vector<1x256xf32>
    %10 = vector.broadcast %9 : vector<1x256xf32> to vector<4x256xf32>
    %11 = arith.subf %5, %10 : vector<4x256xf32>
    %c0_3 = arith.constant 0 : index
    %c0_4 = arith.constant 0 : index
    %c0_5 = arith.constant 0 : index
    %12 = vector.load %arg4[%c0_3, %c0_4, %c0_5] : memref<1x1x256xi32, #tpu.memory_space<vmem>>, vector<1x1x256xi32>
    %13 = vector.shape_cast %12 : vector<1x1x256xi32> to vector<1x256xi32>
    %14 = tpu.iota {dimensions = array<i32: 0>} : vector<4x256xi32>
    %15 = vector.broadcast %13 : vector<1x256xi32> to vector<4x256xi32>
    %16 = arith.cmpi eq, %14, %15 : vector<4x256xi32>
    %cst_6 = arith.constant 0.000000e+00 : f32
    %17 = vector.broadcast %cst_6 : f32 to vector<4x256xf32>
    %18 = arith.select %16, %11, %17 : vector<4x256xi1>, vector<4x256xf32>
    %cst_7 = arith.constant dense<0.000000e+00> : vector<256xf32>
    %19 = vector.multi_reduction <add>, %18, %cst_7 [0] : vector<4x256xf32> to vector<256xf32>
    %20 = vector.shape_cast %19 : vector<256xf32> to vector<1x256xf32>
    %cst_8 = arith.constant 0.000000e+00 : f32
    %21 = vector.broadcast %cst_8 : f32 to vector<1x256xf32>
    %22 = arith.subf %21, %20 : vector<1x256xf32>
    %c0_i32 = arith.constant 0 : i32
    %23 = arith.cmpi eq, %arg2, %c0_i32 : i32
    %24 = arith.extui %23 : i1 to i32
    %c0_i32_9 = arith.constant 0 : i32
    %25 = arith.cmpi ne, %24, %c0_i32_9 : i32
    scf.if %25 {
      %cst_18 = arith.constant 0.000000e+00 : f32
      %30 = vector.broadcast %cst_18 : f32 to vector<1x1x1x256xf32>
      %c0_19 = arith.constant 0 : index
      %c0_20 = arith.constant 0 : index
      %c0_21 = arith.constant 0 : index
      %c0_22 = arith.constant 0 : index
      %31 = vector.load %arg5[%c0_19, %c0_20, %c0_21, %c0_22] : memref<1x1x1x256xf32, #tpu.memory_space<vmem>>, vector<1x1x1x256xf32>
      tpu.vector_store %arg5[%c0_19, %c0_20, %c0_21, %c0_22], %30 {strides = array<i32>} : memref<1x1x1x256xf32, #tpu.memory_space<vmem>>, vector<1x1x1x256xf32>,
    } else {
    }
    %c0_10 = arith.constant 0 : index
    %c0_11 = arith.constant 0 : index
    %c0_12 = arith.constant 0 : index
    %c0_13 = arith.constant 0 : index
    %26 = vector.load %arg5[%c0_10, %c0_11, %c0_12, %c0_13] : memref<1x1x1x256xf32, #tpu.memory_space<vmem>>, vector<1x1x1x256xf32>
    %27 = vector.shape_cast %22 : vector<1x256xf32> to vector<1x1x1x256xf32>
    %28 = arith.addf %26, %27 : vector<1x1x1x256xf32>
    %c0_14 = arith.constant 0 : index
    %c0_15 = arith.constant 0 : index
    %c0_16 = arith.constant 0 : index
    %c0_17 = arith.constant 0 : index
    %29 = vector.load %arg5[%c0_14, %c0_15, %c0_16, %c0_17] : memref<1x1x1x256xf32, #tpu.memory_space<vmem>>, vector<1x1x1x256xf32>
    tpu.vector_store %arg5[%c0_14, %c0_15, %c0_16, %c0_17], %28 {strides = array<i32>} : memref<1x1x1x256xf32, #tpu.memory_space<vmem>>, vector<1x1x1x256xf32>,
    return
  }
  func.func @transform_0(%arg0: i32, %arg1: i32, %arg2: i32) -> (i32, i32, i32) {
    %c1_i32 = arith.constant 1 : i32
    %0 = arith.muli %arg1, %c1_i32 : i32
    %1 = arith.addi %0, %arg2 : i32
    %c0_i32 = arith.constant 0 : i32
    %c0_i32_0 = arith.constant 0 : i32
    return %arg0, %c0_i32, %1 : i32, i32, i32
  }
  func.func @transform_1(%arg0: i32, %arg1: i32, %arg2: i32) -> (i32, i32, i32) {
    %c1_i32 = arith.constant 1 : i32
    %0 = arith.muli %arg1, %c1_i32 : i32
    %1 = arith.addi %0, %arg2 : i32
    %c0_i32 = arith.constant 0 : i32
    %c0_i32_0 = arith.constant 0 : i32
    return %arg0, %c0_i32, %1 : i32, i32, i32
  }
  func.func @transform_2(%arg0: i32, %arg1: i32, %arg2: i32) -> (i32, i32, i32, i32) {
    %c0_i32 = arith.constant 0 : i32
    %c0_i32_0 = arith.constant 0 : i32
    %c0_i32_1 = arith.constant 0 : i32
    return %arg0, %arg1, %c0_i32, %c0_i32_0 : i32, i32, i32, i32
  }
}

</mosaic_0001>

<bundles_post_ra>
// kernel: tpu_custom_call.1
= control target key start
LH: loop header
LB: loop body
LE: loop exit
PB: predicated region body
PF: predicated region fallthrough
CT: control target
= control target key end

     0   :  { %7 = vsyncpa [#allocation3], 0  ;;  %s993_s0 = inlined_call_operand.hbm [shape: f32[2,4,256], index: 0, kind: input, shape index: {}]   ;;  %s994_s1 = inlined_call_operand.hbm [shape: s32[2,1,256], index: 1, kind: input, shape index: {}]   ;;  %s995_s2 = inlined_call_operand.hbm [shape: f32[2,1,1,256], index: 2, kind: output, shape index: {}]  }
   0x1   :  { %9 = vsyncpa [#allocation3 + $0x1], 0 }
   0x2   :  { %10 = vsyncpa [#allocation6], 0 }
   0x3   :  { %12 = vsyncpa [#allocation6 + $0x1], 0 }
   0x4   :  { %13 = vsyncpa [#allocation4], 0 }
   0x5   :  { %15 = vsyncpa [#allocation4 + $0x1], 0  ;;  %s755_s9 = smov 0   ;;  %s757_s10 = smov 0  }
   0x6   :  { %s759_s11 = smov 0   ;;  %s761_s12 = smov 0  }
   0x7   :  { %s763_s13 = smov 0   ;;  %s765_s14 = smov 0  }
   0x8 LB: > { %s489_s15 = sadd.s32 4294967295, %s733_s14   ;;  %s490_s16 = sadd.s32 4294967294, %s733_s14   ;;  %s733_s14 = sphi %s765_s14, %s21_s14   ;;  %s729_s13 = sphi %s763_s13, %s1017_s13   ;;  %s725_s12 = sphi %s761_s12, %s1016_s12   ;;  %s721_s11 = sphi %s759_s11, %s1015_s11   ;;  %s717_s10 = sphi %s757_s10, %s1014_s10   ;;  %s713_s9 = sphi %s755_s9, %s1013_s9  }
   0x9   : > { %s40_s17 = sadd.s32 1, %s729_s13  ;;  %s51_s18 = sadd.s32 1, %s721_s11 }
   0xa   : > { %p42_p0 = scmp.ge.s32.totalorder %s40_s17, 2  ;;  %p58_p1 = scmp.ne.s32.totalorder %s721_s11, %s717_s10 }
   0xb   : > { %p59_p2 = scmp.eq.s32.totalorder %s733_s14, 0  ;;  %p64_p3 = scmp.ne.s32.totalorder %s717_s10, %s713_s9 }
   0xc   : > { %s1019_s17 = smov (%p42_p0, %s40_s17), 0  ;;  %p65_p5 = scmp.eq.s32.totalorder %s489_s15, 0 }
   0xd   : > { %p796_p4 = por %p59_p2, %p58_p1  ;;  %s46_s20 = ssub.s32 %s729_s13, %s1019_s17 }
   0xe   : > { %p120_p6 = scmp.eq.s32.totalorder %s489_s15, 1  ;;  %p49_p7 = scmp.eq.s32.totalorder %s46_s20, 0 }
   0xf   : > { %p802_p8 = por %p65_p5, %p64_p3  ;;  %p126_p10 = scmp.eq.s32.totalorder %s490_s16, 1 }
  0x10   : > { %p806_p9 = por %p120_p6, %p58_p1  ;;  %p528_p13 = scmp.lt.s32.totalorder %s733_s14, 2 }
  0x11   : > { %s999_s21 = scalar_select %p802_p8, 1, 0 }
  0x12   : > { %s1000_s22 = scalar_select %p806_p9, 1, 0 }
  0x13   : > { %s811_s23 = scalar_select %p49_p7, %s721_s11, %s51_s18  }
  0x14   : > { %p813_p11 = por %p126_p10, %p64_p3  ;;  %s820_s25 = sand.u32 1, %s721_s11  }
  0x15   : > { %s493_s26 = sshll.u32 %s820_s25, 3  ;;  %s508_s27 = sshll.u32 %s729_s13, 7 }
  0x16   : > { %s1001_s24 = scalar_select %p813_p11, 1, 0 }
  0x17   : > { %s827_s30 = scalar_lea.hbm %s993_s0, %s508_s27  ;;  %s150_s3 = scalar_lea.vmem [#allocation2], %s493_s26 }
  0x18   : > { %s161_s4 = sshll.u32 %s150_s3, 4  ;;  %p833_p0 = pnand %p528_p13, %p796_p4  ;;  %s829_s4 = int_to_ptr.vmem [resolvable:$true] %s161_s4 }
  0x19   : > { %s147_s6 = scalar_lea.sflag [#allocation3], %s820_s25  ;;  %s587_s7 = scalar_lea.hbm %s827_s30, 128 }
  0x1a   : > { %p588_p3 = scmp.ne.s32.totalorder %s827_s30, %s587_s7  ;;  %p589_p5 = pneg %p833_p0 }
  0x1b   : > { %s592_s16 = scalar_lea.hbm %s993_s0, 256  ;;  %p593_p4 = scmp.lt.u32.totalorder %s827_s30, %s993_s0 }
  0x1c   : > { %p590_p6 = pnand %p589_p5, %p588_p3  ;;  %p594_p10 = scmp.lt.u32.totalorder %s592_s16, %s587_s7 }
  0x1d   : > { %p596_p12 = scmp.lt.u32.totalorder %s587_s7, %s827_s30 }
  0x1e   : > { %p591_p7 = pneg %p590_p6  ;;  %p595_p13 = por %p594_p10, %p593_p4 }
  0x20   : > { %p597_p1 = por %p596_p12, %p595_p13 }
  0x22   : > { %p598_p2 = pnand %p597_p1, %p591_p7 }
  0x24   : > { %601 = shalt.err (!%p598_p2)
}
  0x25   : > { %s602_s20 = scalar_lea.vmem %s829_s4, 128  ;;  %s735_s26 = smov [#allocation2]  }
  0x26   : > { %p603_p3 = scmp.ne.s32.totalorder %s829_s4, %s602_s20  ;;  %s607_s27 = sshll.u32 %s735_s26, 4  ;;  %s608_s27 = int_to_ptr.vmem [resolvable:$false] %s607_s27 }
  0x27   : > { %s609_s28 = scalar_lea.vmem %s608_s27, 256  ;;  %p610_p9 = scmp.lt.s32.totalorder %s829_s4, %s608_s27 }
  0x28   : > { %p605_p6 = pnand %p603_p3, %p589_p5  ;;  %p611_p4 = scmp.lt.s32.totalorder %s609_s28, %s602_s20 }
  0x2a   : > { %p606_p11 = pneg %p605_p6  ;;  %p612_p10 = por %p611_p4, %p610_p9 }
  0x2c   : > { %p613_p12 = pnand %p612_p10, %p606_p11 }
  0x2e   : > { %616 = shalt.err (!%p613_p12)
}
  0x2f   : > { %520 = dma.hbm_to_vmem [thread:$0]  (!%p833_p0), %s827_s30, 128, %s829_s4, %s147_s6  }
  0x30   : > { %p1003_p1 = scmp.lt.s32.totalorder %s733_s14, 3  ;;  %p1004_p2 = scmp.ge.s32.totalorder %s733_s14, 1 }
  0x31   : > { %s496_s3 = sshll.u32 %s820_s25, 1  ;;  %s509_s7 = sshll.u32 %s729_s13, 5 }
  0x32   : > { %p869_p7 = pnand %p1004_p2, %p1003_p1  ;;  %s878_s16 = scalar_lea.hbm %s994_s1, %s509_s7 }
  0x33   : > { %s172_s18 = scalar_lea.vmem [#allocation5], %s496_s3  ;;  %s169_s30 = scalar_lea.sflag [#allocation6], %s820_s25 }
  0x34   : > { %s1005_s29 = scalar_select %p869_p7, 1, 0 }
  0x35   : > { %s183_s19 = sshll.u32 %s172_s18, 4  ;;  %s617_s4 = scalar_lea.hbm %s878_s16, 32  ;;  %s184_s19 = int_to_ptr.vmem [resolvable:$true] %s183_s19 }
  0x36   : > { %p618_p9 = scmp.ne.s32.totalorder %s878_s16, %s617_s4  ;;  %s622_s26 = scalar_lea.hbm %s994_s1, 64 }
  0x37   : > { %p623_p3 = scmp.lt.u32.totalorder %s878_s16, %s994_s1  ;;  %p624_p6 = scmp.lt.u32.totalorder %s622_s26, %s617_s4 }
  0x38   : > { %p620_p11 = pnand %p618_p9, %p589_p5  ;;  %p626_p10 = scmp.lt.u32.totalorder %s617_s4, %s878_s16 }
  0x39   : > { %p625_p4 = por %p624_p6, %p623_p3 }
  0x3a   : > { %p621_p13 = pneg %p620_p11 }
  0x3b   : > { %p627_p12 = por %p626_p10, %p625_p4 }
  0x3d   : > { %p628_p1 = pnand %p627_p12, %p621_p13 }
  0x3f   : > { %631 = shalt.err (!%p628_p1)
}
  0x40   : > { %s632_s25 = scalar_lea.vmem %s184_s19, 32  ;;  %s736_s3 = smov [#allocation5]  }
  0x41   : > { %p633_p2 = scmp.ne.s32.totalorder %s184_s19, %s632_s25  ;;  %s637_s7 = sshll.u32 %s736_s3, 4  ;;  %s638_s7 = int_to_ptr.vmem [resolvable:$false] %s637_s7 }
  0x42   : > { %s639_s8 = scalar_lea.vmem %s638_s7, 64  ;;  %p640_p8 = scmp.lt.s32.totalorder %s184_s19, %s638_s7 }
  0x43   : > { %p635_p9 = pnand %p633_p2, %p589_p5  ;;  %p641_p7 = scmp.lt.s32.totalorder %s639_s8, %s632_s25 }
  0x45   : > { %p636_p11 = pneg %p635_p9  ;;  %p642_p3 = por %p641_p7, %p640_p8 }
  0x47   : > { %p643_p6 = pnand %p642_p3, %p636_p11 }
  0x49   : > { %646 = shalt.err (!%p643_p6)
}
  0x4a   : > { %523 = dma.hbm_to_vmem [thread:$0]  (!%p833_p0), %s878_s16, 32, %s184_s19, %s169_s30  }
  0x4b   : > { %p1006_p13 = scmp.ne.s32.totalorder %s1005_s29, 0 }
  0x4c   : > { %s903_s15 = sand.u32 (!%p1006_p13), 1, %s717_s10   ;;  %p1007_p5 = scmp.ne.s32.totalorder (!%p1006_p13), %s999_s21, 0 }
  0x4d   : > { %192 = sbr.rel (%p1006_p13) target bundleno = 193 (0xc1), region = 28  ;;  %s500_s18 = sshll.u32 (!%p1006_p13), %s903_s15, 3 }
  0x4e   : > { %s195_s4 = scalar_lea.sflag (!%p1006_p13), [#allocation3], %s903_s15  ;;  %s198_s6 = scalar_lea.vmem (!%p1006_p13), [#allocation2], %s500_s18 }
  0x54   : > { %700 = dma.done.wait (%p1007_p5), %s195_s4, 128  }
  0x55   : > { %702 = vsyncadd (%p1007_p5), %s195_s4, 4294967168  ;;  %s501_s5 = sshll.u32 %s903_s15, 1  ;;  %s204_s29 = scalar_lea.sflag [#allocation6], %s903_s15 }
  0x56   : > { %s913_s16 = scalar_lea.vmem [#allocation5], %s501_s5 }
  0x57   : > { %704 = dma.done.wait (%p1007_p5), %s204_s29, 32  }
  0x58   : > { %706 = vsyncadd (%p1007_p5), %s204_s29, 4294967264  ;;  %v290_v0 = vlaneseq  ;;  %s923_s19 = scalar_lea.vmem [#allocation7], %s501_s5  ;;  %v737_v2 = vmov 0.0   ;;  %vm241_vm1 = vcmask 1043456   ;;  %v237_v3 = vld [vmem:[%s198_s6] sm:$0xff]  ;;  %s510_s21 = sshll.u32 %s725_s12, 5 }
  0x59   : > { %v239_v4 = vcombine.high %v237_v3, %v237_v3  ;;  %v242_v5 = vsel %vm241_vm1, %v237_v3, -inf  ;;  %v289_v40 = vld [vmem:[%s913_s16] sm:$0x3]  ;;  %v738_v62 = vmov 1966171168   ;;  %s374_s30 = sshll.u32 %s923_s19, 4  ;;  %s941_s27 = scalar_lea.hbm %s995_s2, %s510_s21  ;;  %s943_s30 = int_to_ptr.vmem [resolvable:$true] %s374_s30 }
  0x5a   : > { %vm919_vm0 = vcmp.lt.s32.totalorder %v290_v0, 256  ;;  %v243_v6 = vrot.slane %v242_v5, 4  ;;  %v291_v38 = vshrl.u32 %v290_v0, 7  ;;  %v337_v63 = vunpack.c.l.s4 %v738_v62  ;;  %s358_s28 = scalar_lea.sflag [#allocation4], %s903_s15  ;;  %s647_s25 = scalar_lea.vmem %s943_s30, 32 }
  0x5b   : > { %331 = vst.msk [vmem:[%s923_s19] sm:$0x3] %vm919_vm0, %v737_v2  ;;  %v249_v7 = vsel %vm241_vm1, %v239_v4, -inf  ;;  %p648_p8 = scmp.ne.s32.totalorder %s943_s30, %s647_s25  ;;  %p1010_p0 = scmp.ne.s32.totalorder %s1000_s22, 0 }
  0x5c   : > { %v244_v8 = vmax.f32 %v242_v5, %v243_v6  ;;  %v250_v9 = vrot.slane %v249_v7, 4  ;;  %v294_v39 = vsub.s32 0, %v291_v38  ;;  %v298_v42 = vsub.s32 1, %v291_v38  ;;  %s739_s12 = smov [#allocation7]  }
  0x5d   : > { %v338_v5 = vunpack.c.0.s8 %v337_v63  ;;  %p649_p7 = pnand %p648_p8, %p1010_p0  ;;  %s651_s3 = sshll.u32 %s739_s12, 4  ;;  %s652_s3 = int_to_ptr.vmem [resolvable:$false] %s651_s3 }
  0x5e   : > { %v245_v10 = vrot.slane %v244_v8, 2  ;;  %v251_v11 = vmax.f32 %v249_v7, %v250_v9  ;;  %v295_v45 = vrot.slane %v289_v40, %v294_v39  ;;  %v299_v47 = vrot.slane %v289_v40, %v298_v42  ;;  %s653_s7 = scalar_lea.vmem %s652_s3, 64  ;;  %p654_p10 = scmp.lt.s32.totalorder %s943_s30, %s652_s3 }
  0x5f   : > { %v341_v9 = vsub.s32 %v338_v5, %v291_v38  ;;  %p650_p4 = pneg %p649_p7  ;;  %p655_p12 = scmp.lt.s32.totalorder %s653_s7, %s647_s25 }
  0x60   : > { %v246_v12 = vmax.f32 %v244_v8, %v245_v10  ;;  %v252_v13 = vrot.slane %v251_v11, 2  ;;  %vm300_vm2 = vcmp.eq.s32.totalorder %v291_v38, %v295_v45  ;;  %vm301_vm3 = vcmp.eq.s32.totalorder %v291_v38, %v299_v47 }
  0x61   : > { %p656_p1 = por %p655_p12, %p654_p10 }
  0x62   : > { %v247_v14 = vrot.slane %v246_v12, 1  ;;  %v253_v15 = vmax.f32 %v251_v11, %v252_v13 }
  0x63   : > { %p657_p2 = pnand %p656_p1, %p650_p4 }
  0x64   : > { %v248_v16 = vmax.f32 %v246_v12, %v247_v14  ;;  %v254_v17 = vrot.slane %v253_v15, 1  ;;  %v332_v12 = vld [vmem:[%s923_s19] sm:$0x3] }
  0x66   : > { %v255_v18 = vmax.f32 %v253_v15, %v254_v17 }
  0x68   : > { %v258_v19 = vcombine.low %v248_v16, %v255_v18 }
  0x6a   : > { %v260_v20 = vsub.f32 %v237_v3, %v258_v19 }
  0x6c   : > { %v261_v21 = vmul.f32 1.442695, %v260_v20 }
  0x6e   : > { %581 = vpow2.f32 %v261_v21 }
  0x78   : > { %v582_v22 = vpop.eup %581 }
  0x79   : > { %v264_v23 = vcombine.high %v582_v22, %v582_v22  ;;  %v266_v24 = vsel %vm241_vm1, %v582_v22, 0.0 }
  0x7a   : > { %v267_v25 = vrot.slane %v266_v24, 4 }
  0x7b   : > { %v273_v26 = vsel %vm241_vm1, %v264_v23, 0.0 }
  0x7c   : > { %v268_v27 = vadd.f32 %v267_v25, %v266_v24  ;;  %v274_v28 = vrot.slane %v273_v26, 4 }
  0x7e   : > { %v269_v29 = vrot.slane %v268_v27, 2  ;;  %v275_v30 = vadd.f32 %v274_v28, %v273_v26 }
  0x80   : > { %v270_v31 = vadd.f32 %v269_v29, %v268_v27  ;;  %v276_v32 = vrot.slane %v275_v30, 2 }
  0x82   : > { %v271_v33 = vrot.slane %v270_v31, 1  ;;  %v277_v34 = vadd.f32 %v276_v32, %v275_v30 }
  0x84   : > { %v272_v35 = vadd.f32 %v271_v33, %v270_v31  ;;  %v278_v36 = vrot.slane %v277_v34, 1 }
  0x86   : > { %v279_v37 = vadd.f32 %v278_v36, %v277_v34  ;;  %583 = vlog2.f32 %v272_v35 }
  0x88   : > { %585 = vlog2.f32 %v279_v37 }
  0x90   : > { %v584_v41 = vpop.eup %583 }
  0x91   : > { %v281_v43 = vmul.f32 0.6931472, %v584_v41 }
  0x92   : > { %v586_v44 = vpop.eup %585 }
  0x93   : > { %v283_v46 = vmul.f32 0.6931472, %v586_v44 }
  0x95   : > { %v286_v48 = vcombine.low %v281_v43, %v283_v46 }
  0x97   : > { %v288_v49 = vsub.f32 %v260_v20, %v286_v48 }
  0x99   : > { %v303_v50 = vcombine.high %v288_v49, %v288_v49  ;;  %v305_v51 = vsel %vm300_vm2, %v288_v49, 0.0 }
  0x9a   : > { %v307_v52 = vsel %vm241_vm1, %v305_v51, 0.0 }
  0x9b   : > { %v306_v53 = vsel %vm301_vm3, %v303_v50, 0.0  ;;  %v308_v54 = vrot.slane %v307_v52, 4 }
  0x9c   : > { %v314_v55 = vsel %vm241_vm1, %v306_v53, 0.0 }
  0x9d   : > { %v309_v56 = vadd.f32 %v308_v54, %v307_v52  ;;  %v315_v57 = vrot.slane %v314_v55, 4 }
  0x9f   : > { %v310_v58 = vrot.slane %v309_v56, 2  ;;  %v316_v59 = vadd.f32 %v315_v57, %v314_v55 }
  0xa1   : > { %v311_v60 = vadd.f32 %v310_v58, %v309_v56  ;;  %v317_v61 = vrot.slane %v316_v59, 2 }
  0xa3   : > { %v312_v0 = vrot.slane %v311_v60, 1  ;;  %v318_v2 = vadd.f32 %v317_v61, %v316_v59 }
  0xa5   : > { %v313_v3 = vadd.f32 %v312_v0, %v311_v60  ;;  %v319_v4 = vrot.slane %v318_v2, 1 }
  0xa7   : > { %v320_v6 = vadd.f32 %v319_v4, %v318_v2  ;;  %v321_v7 = vsub.f32 0.0, %v313_v3 }
  0xa9   : > { %v322_v8 = vsub.f32 0.0, %v320_v6 }
  0xab   : > { %v335_v10 = vcombine.low %v321_v7, %v322_v8 }
  0xad   : > { %v342_v11 = vrot.slane %v335_v10, %v341_v9 }
  0xaf   : > { %v349_v13 = vrot.slane %v342_v11, %v341_v9 }
  0xb1   : > { %v351_v14 = vadd.f32 %v349_v13, %v332_v12 }
  0xb3   : > { %356 = vst.msk [vmem:[%s923_s19] sm:$0x3] %vm919_vm0, %v351_v14 }
  0xb4   : > { %660 = shalt.err (!%p657_p2)
}
  0xb5   : > { %s661_s8 = scalar_lea.hbm %s941_s27, 32  ;;  %s665_s4 = scalar_lea.hbm %s995_s2, 64 }
  0xb6   : > { %p662_p9 = scmp.ne.s32.totalorder %s941_s27, %s661_s8  ;;  %p666_p6 = scmp.lt.u32.totalorder %s941_s27, %s995_s2 }
  0xb7   : > { %p667_p13 = scmp.lt.u32.totalorder %s665_s4, %s661_s8  ;;  %p669_p8 = scmp.lt.u32.totalorder %s661_s8, %s941_s27 }
  0xb8   : > { %p663_p11 = pnand %p662_p9, %p1010_p0 }
  0xb9   : > { %p668_p5 = por %p667_p13, %p666_p6 }
  0xba   : > { %p664_p3 = pneg %p663_p11 }
  0xbb   : > { %p670_p7 = por %p669_p8, %p668_p5 }
  0xbd   : > { %p671_p4 = pnand %p670_p7, %p664_p3 }
  0xbf   : > { %674 = shalt.err (!%p671_p4)
}
  0xc0   : > { %515 = dma.vmem_to_hbm [thread:$0]  (%p1010_p0), %s943_s30, 32, %s941_s27, %s358_s28  }
  0xc1 PF: > { %s386_s29 = sand.u32 1, %s713_s9   ;;  %p1011_p10 = scmp.ne.s32.totalorder %s1001_s24, 0 }
  0xc2   : > { %p1012_p12 = scmp.ge.s32.totalorder %s733_s14, 2  ;;  %s387_s16 = scalar_lea.sflag [#allocation4], %s386_s29 }
  0xc4   : > { %p525_p1 = pnand %p1012_p12, %p1011_p10 }
  0xc6   : > { %708 = dma.done.wait (!%p525_p1), %s387_s16, 32  }
  0xc7   : > { %710 = vsyncadd (!%p525_p1), %s387_s16, 4294967264  ;;  %s21_s14 = sadd.s32 1, %s733_s14   ;;  %s1013_s9 = smov %s717_s10 }
  0xc8   : > { %p18_p2 = scmp.ge.s32.totalorder %s21_s14, 4   ;;  %s1014_s10 = smov %s721_s11 }
  0xc9   : > { %s1015_s11 = smov %s811_s23  ;;  %s1016_s12 = smov %s729_s13 }
  0xca   : > { %s1017_s13 = smov %s1019_s17  ;;  %20 = sbr.rel (!%p18_p2) target bundleno = 8 (0x8), region = 90 }
  0xd1   :  { %392 = vsyncpa [#allocation3], 1 }
  0xd2   :  { %394 = vsyncpa [#allocation3 + $0x1], 1 }
  0xd3   :  { %395 = vsyncpa [#allocation6], 1 }
  0xd4   :  { %397 = vsyncpa [#allocation6 + $0x1], 1 }
  0xd5   :  { %398 = vsyncpa [#allocation4], 1 }
  0xd6   :  { %400 = vsyncpa [#allocation4 + $0x1], 1 }

</bundles_post_ra>
